<compile_context>
chip_gen: v5e
topology: v5e:2x2
jax: 0.10.0
libtpu: 0.0.40
codegen_flags: <defaults>
</compile_context>

<pallas_src>
import functools

import jax
import jax.numpy as jnp
from jax.experimental import pallas as pl
from jax.experimental.pallas import tpu as pltpu


def _grasp_valid_kernel(x_ref, w1_ref, b1_ref, w2_ref, b2_ref, w3_ref, b3_ref,
                        o_ref, *, bf16_epilogue):
    # x tile: (TM, D) f32 -> bf16 for the MXU.  w1/w2/w3/b1/b2 are bf16, b3 f32.
    x = x_ref[...].astype(jnp.bfloat16)

    # l1 / l2: MXU matmuls, f32 accumulation.
    h1 = jnp.dot(x, w1_ref[...], preferred_element_type=jnp.float32)
    if bf16_epilogue:
        # v6e/v7x: bf16 VALU -> bias+ReLU on bf16 halves the live intermediate.
        h1 = jnp.maximum(h1.astype(jnp.bfloat16) + b1_ref[...], 0)
        h2 = jnp.dot(h1, w2_ref[...], preferred_element_type=jnp.float32)
        h2 = jnp.maximum(h2.astype(jnp.bfloat16) + b2_ref[...], 0)
    else:
        # v5e and older: no bf16 VPU, keep the elementwise epilogue in f32.
        # TODO(synk): v5e-only: fuse l1/l2 over 128-wide column slabs so the
        # live f32 intermediate stays inside the vreg file (less spill vst).
        h1 = jnp.maximum(h1 + b1_ref[...].astype(jnp.float32), 0.0)
        h2 = jnp.dot(h1.astype(jnp.bfloat16), w2_ref[...],
                     preferred_element_type=jnp.float32)
        h2 = jnp.maximum(h2 + b2_ref[...].astype(jnp.float32), 0.0)
        h2 = h2.astype(jnp.bfloat16)

    # l3 (256 -> 1): contract against the w3 row (rhs-transposed matmul, same
    # pattern as q @ k^T) so the result is already the lane-dense (1, TM) row
    # the output block wants; bias, sigmoid and store run on packed vregs.
    z = jnp.einsum("oh,mh->om", w3_ref[...], h2,
                   preferred_element_type=jnp.float32)            # (1, TM) f32
    o_ref[...] = jax.nn.sigmoid(z + b3_ref[...]).astype(o_ref.dtype)


def _round_up(x, m):
    return (x + m - 1) // m * m


def _epilogue_in_bf16():
    """bf16 bias+ReLU only where the VPU natively supports bf16 (v6e / v7x)."""
    try:
        kind = jax.devices()[0].device_kind.lower()
    except Exception:
        return True
    return not any(v in kind for v in ("v2", "v3", "v4", "v5"))


def grasp_valid_forward(state, w1, b1, w2, b2, w3, b3, *, tm_max=512,
                        bf16_epilogue=None):
    """state: (B, state_dim) f32.  Weights in (in, out) layout (torch W.T).

    Returns (B, 1) f32 in [0, 1], matching GraspValid_net.forward.
    """
    if bf16_epilogue is None:
        bf16_epilogue = _epilogue_in_bf16()

    B, D = state.shape
    H = w1.shape[1]                                    # 256

    # Batch tiling: one full-array tile for small batches; otherwise TM=tm_max
    # (multiple of 128 -> lane-aligned output blocks) with n_tiles >= 2 so the
    # "parallel" axis can shard across v7x's two TensorCores.
    b8 = _round_up(B, 8)
    tm = b8 if b8 <= tm_max else tm_max
    b_pad = _round_up(b8, tm)
    n_tiles = b_pad // tm

    # Only cheap row padding (no full pad+cast copy of the activations).
    x = state
    if b_pad != B:
        x = jnp.zeros((b_pad, D), state.dtype).at[:B, :].set(state)

    # Small, VMEM-resident bf16 weights (f32 accumulation in the kernel).
    w1b = w1.astype(jnp.bfloat16)                      # (D, H)
    w2b = w2.astype(jnp.bfloat16)                      # (H, H)
    w3r = w3.reshape(1, H).astype(jnp.bfloat16)        # (H, 1) -> (1, H) row
    b1r = b1.reshape(1, H).astype(jnp.bfloat16)
    b2r = b2.reshape(1, H).astype(jnp.bfloat16)
    b3r = b3.reshape(1, 1).astype(jnp.float32)

    cost = pl.CostEstimate(
        flops=2 * b_pad * (D * H + H * H + H),
        transcendentals=b_pad,                          # one sigmoid per row
        bytes_accessed=(x.size * 4 + w1b.size * 2 + w2b.size * 2 + w3r.size * 2
                        + b1r.size * 2 + b2r.size * 2 + 4 + b_pad * 4),
    )

    # Real footprint at TM=512 is ~1-2 MiB; cap the scoped VMEM accordingly.
    x_tile_bytes = tm * D * 4
    w_bytes = 2 * (D * H + H * H + 3 * H)
    vmem_limit = int(min(100 * 2**20,
                         max(8 * 2**20,
                             4 * x_tile_bytes + 2 * w_bytes + 8 * tm * H * 4)))

    kernel = functools.partial(_grasp_valid_kernel, bf16_epilogue=bf16_epilogue)

    out = pl.pallas_call(
        kernel,
        out_shape=jax.ShapeDtypeStruct((n_tiles, tm), jnp.float32),
        grid=(n_tiles,),
        in_specs=[
            pl.BlockSpec((tm, D), lambda i: (i, 0)),   # x tile streams (f32)
            pl.BlockSpec((D, H), lambda i: (0, 0)),    # w1: VMEM-resident
            pl.BlockSpec((1, H), lambda i: (0, 0)),    # b1
            pl.BlockSpec((H, H), lambda i: (0, 0)),    # w2
            pl.BlockSpec((1, H), lambda i: (0, 0)),    # b2
            pl.BlockSpec((1, H), lambda i: (0, 0)),    # w3 (row)
            pl.BlockSpec((1, 1), lambda i: (0, 0)),    # b3
        ],
        out_specs=pl.BlockSpec((1, tm), lambda i: (i, 0)),  # lane-dense rows
        compiler_params=pltpu.CompilerParams(
            dimension_semantics=("parallel",),
            vmem_limit_bytes=vmem_limit,
        ),
        cost_estimate=cost,
    )(x, w1b, b1r, w2b, b2r, w3r, b3r)

    return out.reshape(b_pad, 1)[:B]


def init_params(key, state_dim, hidden=256, out_dim=1):
    """Deterministic synthetic init mimicking nn.Linear (U(-1/sqrt(fan_in), ..))."""
    ks = jax.random.split(key, 6)

    def linear(kw, kb, fan_in, fan_out):
        bound = 1.0 / jnp.sqrt(jnp.float32(fan_in))
        w = jax.random.uniform(kw, (fan_in, fan_out), jnp.float32, -bound, bound)
        b = jax.random.uniform(kb, (1, fan_out), jnp.float32, -bound, bound)
        return w, b

    w1, b1 = linear(ks[0], ks[1], state_dim, hidden)
    w2, b2 = linear(ks[2], ks[3], hidden, hidden)
    w3, b3 = linear(ks[4], ks[5], hidden, out_dim)
    return w1, b1, w2, b2, w3, b3


def _reference_f32(state, params):
    w1, b1, w2, b2, w3, b3 = params
    a = jnp.maximum(state @ w1 + b1, 0.0)
    a = jnp.maximum(a @ w2 + b2, 0.0)
    return jax.nn.sigmoid(a @ w3 + b3)


def _reference_mirrored(state, params, bf16_epilogue):
    """Pure-JAX reference mirroring the kernel's bf16/f32 rounding points."""
    w1, b1, w2, b2, w3, b3 = params
    f32, bf = jnp.float32, jnp.bfloat16
    x = state.astype(bf).astype(f32)
    w1f = w1.astype(bf).astype(f32)
    w2f = w2.astype(bf).astype(f32)
    w3f = w3.astype(bf).astype(f32)
    h1 = x @ w1f
    if bf16_epilogue:
        h1 = jnp.maximum(h1.astype(bf) + b1.astype(bf), 0)          # bf16
        h2 = h1.astype(f32) @ w2f
        h2 = jnp.maximum(h2.astype(bf) + b2.astype(bf), 0)          # bf16
        h2 = h2.astype(f32)
    else:
        h1 = jnp.maximum(h1 + b1.astype(bf).astype(f32), 0.0)
        h2 = h1.astype(bf).astype(f32) @ w2f
        h2 = jnp.maximum(h2 + b2.astype(bf).astype(f32), 0.0)
        h2 = h2.astype(bf).astype(f32)
    return jax.nn.sigmoid(h2 @ w3f + b3)


def _check(out, state, params, bf16_epilogue):
    B = state.shape[0]
    assert out.shape == (B, 1)
    assert bool(jnp.all(jnp.isfinite(out)))
    assert bool(jnp.all((out >= 0.0) & (out <= 1.0)))
    ref_m = _reference_mirrored(state, params, bf16_epilogue)
    assert bool(jnp.allclose(out, ref_m, atol=1e-2)), (
        float(jnp.max(jnp.abs(out - ref_m))))
    ref32 = _reference_f32(state, params)
    assert bool(jnp.allclose(out, ref32, atol=5e-2)), (
        float(jnp.max(jnp.abs(out - ref32))))


if __name__ == "__main__":
    key = jax.random.PRNGKey(0)
    k_state, k_params, k_state2 = jax.random.split(key, 3)

    state_dim = 72        # GraspValid_net(state_dim); any state_dim works
    params = init_params(k_params, state_dim)
    use_bf16 = _epilogue_in_bf16()

    # Small-batch path: one full-array tile.
    batch = 8
    state = jax.random.normal(k_state, (batch, state_dim), dtype=jnp.float32)
    out = jax.block_until_ready(
        grasp_valid_forward(state, *params, bf16_epilogue=use_bf16))
    _check(out, state, params, use_bf16)

    # Multi-tile path: TM=512, 2 grid tiles, ragged batch handled by padding.
    batch2 = 600
    state2 = jax.random.normal(k_state2, (batch2, state_dim), dtype=jnp.float32)
    out2 = jax.block_until_ready(
        grasp_valid_forward(state2, *params, bf16_epilogue=use_bf16))
    _check(out2, state2, params, use_bf16)

    print("KERNEL_OK")
</pallas_src>

<mosaic_0001>
module attributes {stable_mosaic.version = 11 : i64} {
  func.func @_grasp_valid_kernel(%arg0: i32, %arg1: memref<8x72xf32, #tpu.memory_space<vmem>>, %arg2: memref<72x256xbf16, #tpu.memory_space<vmem>>, %arg3: memref<1x256xbf16, #tpu.memory_space<vmem>>, %arg4: memref<256x256xbf16, #tpu.memory_space<vmem>>, %arg5: memref<1x256xbf16, #tpu.memory_space<vmem>>, %arg6: memref<1x256xbf16, #tpu.memory_space<vmem>>, %arg7: memref<1x1xf32, #tpu.memory_space<vmem>>, %arg8: memref<1x8xf32, #tpu.memory_space<vmem>>) attributes {dimension_semantics = [#tpu.dimension_semantics<parallel>], iteration_bounds = array<i64: 1>, scalar_prefetch = 0 : i64, scratch_operands = 0 : i64, tpu.core_type = #tpu.core_type<tc>, window_params = [{transform_indices = @transform_0, window_bounds = array<i64: 8, 72>}, {pipeline_mode = #tpu.pipeline_mode<synchronous>, transform_indices = @transform_1, window_bounds = array<i64: 72, 256>}, {pipeline_mode = #tpu.pipeline_mode<synchronous>, transform_indices = @transform_2, window_bounds = array<i64: 1, 256>}, {pipeline_mode = #tpu.pipeline_mode<synchronous>, transform_indices = @transform_3, window_bounds = array<i64: 256, 256>}, {pipeline_mode = #tpu.pipeline_mode<synchronous>, transform_indices = @transform_4, window_bounds = array<i64: 1, 256>}, {pipeline_mode = #tpu.pipeline_mode<synchronous>, transform_indices = @transform_5, window_bounds = array<i64: 1, 256>}, {pipeline_mode = #tpu.pipeline_mode<synchronous>, transform_indices = @transform_6, window_bounds = array<i64: 1, 1>}, {transform_indices = @transform_7, window_bounds = array<i64: 1, 8>}]} {
    %c0 = arith.constant 0 : index
    %c0_0 = arith.constant 0 : index
    %0 = vector.load %arg1[%c0, %c0_0] : memref<8x72xf32, #tpu.memory_space<vmem>>, vector<8x72xf32>
    %1 = arith.truncf %0 : vector<8x72xf32> to vector<8x72xbf16>
    %c0_1 = arith.constant 0 : index
    %c0_2 = arith.constant 0 : index
    %2 = vector.load %arg2[%c0_1, %c0_2] : memref<72x256xbf16, #tpu.memory_space<vmem>>, vector<72x256xbf16>
    %cst = arith.constant dense<0.000000e+00> : vector<8x256xf32>
    %3 = tpu.matmul %1, %2, %cst {dimension_numbers = #tpu.dot_dimension_numbers<[1], [0], [0], [1], [0, 0, 1, 1], [], []>} : vector<8x72xbf16>, vector<72x256xbf16>, vector<8x256xf32> -> vector<8x256xf32>
    %4 = arith.truncf %3 : vector<8x256xf32> to vector<8x256xbf16>
    %c0_3 = arith.constant 0 : index
    %c0_4 = arith.constant 0 : index
    %5 = vector.load %arg3[%c0_3, %c0_4] : memref<1x256xbf16, #tpu.memory_space<vmem>>, vector<1x256xbf16>
    %6 = vector.broadcast %5 : vector<1x256xbf16> to vector<8x256xbf16>
    %7 = arith.addf %4, %6 : vector<8x256xbf16>
    %cst_5 = arith.constant 0.000000e+00 : bf16
    %8 = vector.broadcast %cst_5 : bf16 to vector<8x256xbf16>
    %9 = arith.maximumf %7, %8 : vector<8x256xbf16>
    %c0_6 = arith.constant 0 : index
    %c0_7 = arith.constant 0 : index
    %10 = vector.load %arg4[%c0_6, %c0_7] : memref<256x256xbf16, #tpu.memory_space<vmem>>, vector<256x256xbf16>
    %cst_8 = arith.constant dense<0.000000e+00> : vector<8x256xf32>
    %11 = tpu.matmul %9, %10, %cst_8 {dimension_numbers = #tpu.dot_dimension_numbers<[1], [0], [0], [1], [0, 0, 1, 1], [], []>} : vector<8x256xbf16>, vector<256x256xbf16>, vector<8x256xf32> -> vector<8x256xf32>
    %12 = arith.truncf %11 : vector<8x256xf32> to vector<8x256xbf16>
    %c0_9 = arith.constant 0 : index
    %c0_10 = arith.constant 0 : index
    %13 = vector.load %arg5[%c0_9, %c0_10] : memref<1x256xbf16, #tpu.memory_space<vmem>>, vector<1x256xbf16>
    %14 = vector.broadcast %13 : vector<1x256xbf16> to vector<8x256xbf16>
    %15 = arith.addf %12, %14 : vector<8x256xbf16>
    %cst_11 = arith.constant 0.000000e+00 : bf16
    %16 = vector.broadcast %cst_11 : bf16 to vector<8x256xbf16>
    %17 = arith.maximumf %15, %16 : vector<8x256xbf16>
    %c0_12 = arith.constant 0 : index
    %c0_13 = arith.constant 0 : index
    %18 = vector.load %arg6[%c0_12, %c0_13] : memref<1x256xbf16, #tpu.memory_space<vmem>>, vector<1x256xbf16>
    "tpu.trace_start"() <{level = 10 : i32, message = "oh,mh->om"}> : () -> ()
    %cst_14 = arith.constant dense<0.000000e+00> : vector<1x8xf32>
    %19 = tpu.matmul %18, %17, %cst_14 {dimension_numbers = #tpu.dot_dimension_numbers<[1], [1], [0], [0], [0, 0, 1, 0], [], []>} : vector<1x256xbf16>, vector<8x256xbf16>, vector<1x8xf32> -> vector<1x8xf32>
    "tpu.trace_stop"() : () -> ()
    %c0_15 = arith.constant 0 : index
    %c0_16 = arith.constant 0 : index
    %20 = vector.load %arg7[%c0_15, %c0_16] : memref<1x1xf32, #tpu.memory_space<vmem>>, vector<1x1xf32>
    %21 = vector.broadcast %20 : vector<1x1xf32> to vector<1x8xf32>
    %22 = arith.addf %19, %21 : vector<1x8xf32>
    %23 = arith.negf %22 : vector<1x8xf32>
    %24 = math.exp %23 : vector<1x8xf32>
    %cst_17 = arith.constant 1.000000e+00 : f32
    %25 = vector.broadcast %cst_17 : f32 to vector<1x8xf32>
    %26 = arith.addf %25, %24 : vector<1x8xf32>
    %27 = arith.divf %25, %26 : vector<1x8xf32>
    %c0_18 = arith.constant 0 : index
    %c0_19 = arith.constant 0 : index
    %28 = vector.load %arg8[%c0_18, %c0_19] : memref<1x8xf32, #tpu.memory_space<vmem>>, vector<1x8xf32>
    tpu.vector_store %arg8[%c0_18, %c0_19], %27 {strides = array<i32>} : memref<1x8xf32, #tpu.memory_space<vmem>>, vector<1x8xf32>,
    return
  }
  func.func @transform_0(%arg0: i32) -> (i32, i32) {
    %c0_i32 = arith.constant 0 : i32
    %c0_i32_0 = arith.constant 0 : i32
    return %arg0, %c0_i32 : i32, i32
  }
  func.func @transform_1(%arg0: i32) -> (i32, i32) {
    %c0_i32 = arith.constant 0 : i32
    %c0_i32_0 = arith.constant 0 : i32
    %c0_i32_1 = arith.constant 0 : i32
    return %c0_i32, %c0_i32_0 : i32, i32
  }
  func.func @transform_2(%arg0: i32) -> (i32, i32) {
    %c0_i32 = arith.constant 0 : i32
    %c0_i32_0 = arith.constant 0 : i32
    %c0_i32_1 = arith.constant 0 : i32
    return %c0_i32, %c0_i32_0 : i32, i32
  }
  func.func @transform_3(%arg0: i32) -> (i32, i32) {
    %c0_i32 = arith.constant 0 : i32
    %c0_i32_0 = arith.constant 0 : i32
    %c0_i32_1 = arith.constant 0 : i32
    return %c0_i32, %c0_i32_0 : i32, i32
  }
  func.func @transform_4(%arg0: i32) -> (i32, i32) {
    %c0_i32 = arith.constant 0 : i32
    %c0_i32_0 = arith.constant 0 : i32
    %c0_i32_1 = arith.constant 0 : i32
    return %c0_i32, %c0_i32_0 : i32, i32
  }
  func.func @transform_5(%arg0: i32) -> (i32, i32) {
    %c0_i32 = arith.constant 0 : i32
    %c0_i32_0 = arith.constant 0 : i32
    %c0_i32_1 = arith.constant 0 : i32
    return %c0_i32, %c0_i32_0 : i32, i32
  }
  func.func @transform_6(%arg0: i32) -> (i32, i32) {
    %c0_i32 = arith.constant 0 : i32
    %c0_i32_0 = arith.constant 0 : i32
    %c0_i32_1 = arith.constant 0 : i32
    return %c0_i32, %c0_i32_0 : i32, i32
  }
  func.func @transform_7(%arg0: i32) -> (i32, i32) {
    %c0_i32 = arith.constant 0 : i32
    %c0_i32_0 = arith.constant 0 : i32
    return %arg0, %c0_i32 : i32, i32
  }
}

</mosaic_0001>

<bundles_post_ra>
// kernel: tpu_custom_call.1
= control target key start
LH: loop header
LB: loop body
LE: loop exit
PB: predicated region body
PF: predicated region fallthrough
CT: control target
= control target key end

     0   :  { %s929_s0 = inlined_call_operand.hbm [shape: f32[8,72], index: 0, kind: input, shape index: {}]   ;;  %s930_s1 = inlined_call_operand.hbm [shape: bf16[72,256], index: 1, kind: input, shape index: {}]   ;;  %s931_s2 = inlined_call_operand.vmem [shape: bf16[1,256], index: 2, kind: input, shape index: {}]   ;;  %s932_s3 = inlined_call_operand.hbm [shape: bf16[256,256], index: 3, kind: input, shape index: {}]   ;;  %s933_s4 = inlined_call_operand.vmem [shape: bf16[1,256], index: 4, kind: input, shape index: {}]   ;;  %s934_s5 = inlined_call_operand.vmem [shape: bf16[1,256], index: 5, kind: input, shape index: {}]   ;;  %s935_s6 = inlined_call_operand.<no memory space> [shape: f32[1,1], index: 6, kind: input, shape index: {}]   ;;  %s936_s7 = inlined_call_operand.hbm [shape: f32[1,8], index: 7, kind: output, shape index: {}]  }
   0x1   :  { %v12_v0 = vstv %s935_s6 }
   0x2   :  { %13 = vst [vmem:[#allocation2] sm:$0x1] %v12_v0 }
   0x3   :  { %14 = vsyncpa [#allocation4], 0 }
   0x4   :  { %15 = vsyncpa [#allocation7], 0  ;;  %s32_s28 = sshll.u32 %s930_s1, 4  ;;  %s33_s28 = int_to_ptr.hbm [resolvable:$true] %s32_s28 }
   0x5   :  { %16 = vsyncpa [#allocation5], 0  ;;  %s858_s29 = smov [#allocation6]   ;;  %s22_s10 = sshll.u32 %s929_s0, 4  ;;  %s23_s10 = int_to_ptr.hbm [resolvable:$true] %s22_s10 }
   0x6   :  { %s34_s30 = sshll.u32 %s858_s29, 4  ;;  %s859_s11 = smov 128   ;;  %s35_s30 = int_to_ptr.vmem [resolvable:$true] %s34_s30 }
   0x7   :  { %s860_s12 = smov 8   ;;  %s861_s6 = smov [#allocation3]  }
   0x8   :  { %40 = dma.hbm_to_vmem [thread:$0]  %s33_s28, 1152, %s35_s30, [#allocation7], %s859_s11, %s859_s11, %s860_s12  }
   0x9   :  { %s24_s13 = sshll.u32 %s861_s6, 4  ;;  %s47_s16 = sshll.u32 %s932_s3, 4  ;;  %s25_s13 = int_to_ptr.vmem [resolvable:$true] %s24_s13  ;;  %s48_s16 = int_to_ptr.hbm [resolvable:$true] %s47_s16 }
   0xa   :  { %27 = dma.hbm_to_vmem [thread:$0]  %s23_s10, 128, %s25_s13, [#allocation4]  }
   0xb   :  { %s862_s1 = smov [#allocation8]  }
   0xc   :  { %s49_s17 = sshll.u32 %s862_s1, 4  ;;  %s50_s17 = int_to_ptr.vmem [resolvable:$true] %s49_s17 }
   0xd   :  { %55 = dma.hbm_to_vmem [thread:$0]  %s48_s16, 4096, %s50_s17, [#allocation7], %s859_s11, %s859_s11, %s860_s12  }
   0xe   :  { %852 = dma.done.wait [#allocation4], 128  }
   0xf   :  { %853 = vsyncadd [#allocation4], 4294967168 }
  0x10   :  { %854 = dma.done.wait [#allocation7], 5248  }
  0x11   :  { %855 = vsyncadd [#allocation7], 4294962048  ;;  %v85_v1 = vld [vmem:[#allocation6 + $0x40] sm:$0xff]  ;;  %vm135_vm0 = vcmask 1043456   ;;  %v567_v4 = vld [vmem:[#allocation6 + $0x30] sm:$0xf] }
  0x12   :  { %v111_v2 = vunpack.c.l.b16 %v85_v1  ;;  %v112_v3 = vunpack.c.h.b16 %v85_v1  ;;  %v711_v7 = vld [vmem:[#allocation6 + $0x34] sm:$0xf0]  ;;  %v710_v8 = vld [vmem:[#allocation6 + $0x34] sm:$0xf]  ;;  %v569_v9 = vld [vmem:[#allocation6 + $0x38] sm:$0xf0] }
  0x13   :  { %v559_v12 = vld [vmem:[#allocation6 + $0x20] sm:$0xf]  ;;  %v709_v13 = vld [vmem:[#allocation6 + $0x24] sm:$0xf0]  ;;  %v568_v14 = vor.u32 %v711_v7, %v567_v4  ;;  %v572_v15 = vor.u32 %v710_v8, %v569_v9  ;;  %v708_v16 = vld [vmem:[#allocation6 + $0x24] sm:$0xf] }
  0x14   :  { %v121_v5 = vpack.c.b16 %v111_v2, %v111_v2  ;;  %v122_v6 = vpack.c.b16 %v112_v3, %v112_v3  ;;  %v633_v17 = vld [vmem:[#allocation8 + $0x70] sm:$0xf]  ;;  %v727_v18 = vld [vmem:[#allocation8 + $0x74] sm:$0xf0]  ;;  %v561_v19 = vld [vmem:[#allocation6 + $0x28] sm:$0xf0]  ;;  %v560_v27 = vor.u32 %v709_v13, %v559_v12 }
  0x15   :  { %v634_v20 = vor.u32 %v727_v18, %v633_v17  ;;  %v697_v21 = vld [vmem:[#allocation8 + $0xf0] sm:$0xf]  ;;  %v743_v22 = vld [vmem:[#allocation8 + $0xf4] sm:$0xf0]  ;;  %v625_v24 = vld [vmem:[#allocation8 + $0x60] sm:$0xf]  ;;  %v564_v28 = vor.u32 %v708_v16, %v561_v19 }
  0x16   :  { %v137_v10 = vsel %vm135_vm0, %v121_v5, 0  ;;  %v140_v11 = vsel %vm135_vm0, %v122_v6, 0  ;;  %v698_v23 = vor.u32 %v743_v22, %v697_v21  ;;  %v725_v25 = vld [vmem:[#allocation8 + $0x64] sm:$0xf0]  ;;  %v689_v26 = vld [vmem:[#allocation8 + $0xe0] sm:$0xf] }
  0x17   :  { %145 = vmatpush.bf16.msra.mxu0 %v137_v10  ;;  %158 = vmatpush.bf16.msra.mxu1 %v140_v11  ;;  %v551_v29 = vld [vmem:[#allocation6 + $0x10] sm:$0xf]  ;;  %v707_v30 = vld [vmem:[#allocation6 + $0x14] sm:$0xf0]  ;;  %v626_v31 = vor.u32 %v725_v25, %v625_v24  ;;  %v706_v33 = vld [vmem:[#allocation6 + $0x14] sm:$0xf] }
  0x18   :  { %385 = vmatpush.bf16.msra.mxu2 %v634_v20  ;;  %v741_v32 = vld [vmem:[#allocation8 + $0xe4] sm:$0xf0]  ;;  %v553_v34 = vld [vmem:[#allocation6 + $0x18] sm:$0xf0]  ;;  %398 = vmatpush.bf16.msra.mxu3 %v698_v23  ;;  %v617_v36 = vld [vmem:[#allocation8 + $0x50] sm:$0xf]  ;;  %v552_v42 = vor.u32 %v707_v30, %v551_v29 }
  0x19   :  { %v690_v35 = vor.u32 %v741_v32, %v689_v26  ;;  %v723_v37 = vld [vmem:[#allocation8 + $0x54] sm:$0xf0]  ;;  %v681_v38 = vld [vmem:[#allocation8 + $0xd0] sm:$0xf]  ;;  %v556_v43 = vor.u32 %v706_v33, %v553_v34  ;;  %v705_v44 = vld [vmem:[#allocation6 + $0x4] sm:$0xf0] }
  0x1a   :  { %v739_v39 = vld [vmem:[#allocation8 + $0xd4] sm:$0xf0]  ;;  %v618_v41 = vor.u32 %v723_v37, %v617_v36  ;;  %v609_v45 = vld [vmem:[#allocation8 + $0x40] sm:$0xf]  ;;  %v721_v46 = vld [vmem:[#allocation8 + $0x44] sm:$0xf0] }
  0x1b   :  { %146 = vmatpush.bf16.msra.mxu0 %v568_v14  ;;  %159 = vmatpush.bf16.msra.mxu1 %v572_v15  ;;  %v543_v40 = vld [vmem:[#allocation6] sm:$0xf]  ;;  %v704_v47 = vld [vmem:[#allocation6 + $0x4] sm:$0xf]  ;;  %v545_v48 = vld [vmem:[#allocation6 + $0x8] sm:$0xf0]  ;;  %v682_v50 = vor.u32 %v739_v39, %v681_v38  ;;  %v610_v54 = vor.u32 %v721_v46, %v609_v45 }
  0x1c   :  { %386 = vmatpush.bf16.msra.mxu2 %v626_v31  ;;  %v726_v49 = vld [vmem:[#allocation8 + $0x74] sm:$0xf]  ;;  %399 = vmatpush.bf16.msra.mxu3 %v690_v35  ;;  %v635_v51 = vld [vmem:[#allocation8 + $0x78] sm:$0xf0]  ;;  %v673_v55 = vld [vmem:[#allocation8 + $0xc0] sm:$0xf]  ;;  %v544_v57 = vor.u32 %v705_v44, %v543_v40  ;;  %v548_v58 = vor.u32 %v704_v47, %v545_v48 }
  0x1d   :  { %v742_v52 = vld [vmem:[#allocation8 + $0xf4] sm:$0xf]  ;;  %v699_v53 = vld [vmem:[#allocation8 + $0xf8] sm:$0xf0]  ;;  %v737_v56 = vld [vmem:[#allocation8 + $0xc4] sm:$0xf0]  ;;  %v638_v60 = vor.u32 %v726_v49, %v635_v51 }
  0x1e   :  { %v75_v59 = vld [vmem:[#allocation3] sm:$0xff]  ;;  %v702_v61 = vor.u32 %v742_v52, %v699_v53  ;;  %v724_v62 = vld [vmem:[#allocation8 + $0x64] sm:$0xf]  ;;  %v719_v0 = vld [vmem:[#allocation8 + $0x34] sm:$0xf0]  ;;  %v674_v4 = vor.u32 %v737_v56, %v673_v55  ;;  %vm131_vm1 = vcmask 588800  }
  0x1f   :  { %147 = vmatpush.bf16.msra.mxu0 %v560_v27  ;;  %160 = vmatpush.bf16.msra.mxu1 %v564_v28  ;;  %v601_v63 = vld [vmem:[#allocation8 + $0x30] sm:$0xf]  ;;  %v627_v1 = vld [vmem:[#allocation8 + $0x68] sm:$0xf0]  ;;  %v740_v2 = vld [vmem:[#allocation8 + $0xe4] sm:$0xf]  ;;  %v76_v5 = vpack.c.bf16 %v75_v59, %v75_v59 }
  0x20   :  { %387 = vmatpush.bf16.msra.mxu2 %v618_v41  ;;  %400 = vmatpush.bf16.msra.mxu3 %v682_v50  ;;  %v691_v3 = vld [vmem:[#allocation8 + $0xe8] sm:$0xf0]  ;;  %v665_v6 = vld [vmem:[#allocation8 + $0xb0] sm:$0xf]  ;;  %v735_v7 = vld [vmem:[#allocation8 + $0xb4] sm:$0xf0]  ;;  %v602_v8 = vor.u32 %v719_v0, %v601_v63  ;;  %v630_v9 = vor.u32 %v724_v62, %v627_v1 }
  0x21   :  { %v694_v10 = vor.u32 %v740_v2, %v691_v3  ;;  %v722_v11 = vld [vmem:[#allocation8 + $0x54] sm:$0xf]  ;;  %v619_v12 = vld [vmem:[#allocation8 + $0x58] sm:$0xf0]  ;;  %v666_v15 = vor.u32 %v735_v7, %v665_v6  ;;  %v720_v18 = vld [vmem:[#allocation8 + $0x44] sm:$0xf] }
  0x22   :  { %v738_v13 = vld [vmem:[#allocation8 + $0xd4] sm:$0xf]  ;;  %v683_v14 = vld [vmem:[#allocation8 + $0xd8] sm:$0xf0]  ;;  %v622_v16 = vor.u32 %v722_v11, %v619_v12  ;;  %v611_v19 = vld [vmem:[#allocation8 + $0x48] sm:$0xf0] }
  0x23   :  { %148 = vmatpush.bf16.msra.mxu0 %v552_v42  ;;  %161 = vmatpush.bf16.msra.mxu1 %v556_v43  ;;  %v686_v17 = vor.u32 %v738_v13, %v683_v14  ;;  %v736_v20 = vld [vmem:[#allocation8 + $0xc4] sm:$0xf]  ;;  %v675_v21 = vld [vmem:[#allocation8 + $0xc8] sm:$0xf0]  ;;  %v614_v22 = vor.u32 %v720_v18, %v611_v19  ;;  %v718_v24 = vld [vmem:[#allocation8 + $0x34] sm:$0xf] }
  0x24   :  { %388 = vmatpush.bf16.msra.mxu2 %v610_v54  ;;  %401 = vmatpush.bf16.msra.mxu3 %v674_v4  ;;  %v678_v23 = vor.u32 %v736_v20, %v675_v21  ;;  %v603_v25 = vld [vmem:[#allocation8 + $0x38] sm:$0xf0]  ;;  %v734_v26 = vld [vmem:[#allocation8 + $0xb4] sm:$0xf]  ;;  %v169_v30 = vld [vmem:[%s931_s2] sm:$0x3] }
  0x25   :  { %v667_v27 = vld [vmem:[#allocation8 + $0xb8] sm:$0xf0]  ;;  %v606_v28 = vor.u32 %v718_v24, %v603_v25  ;;  %171 = vst [vmem:[#allocation1] ss:$9 sm:$0xff] %v169_v30  ;;  %v593_v31 = vld [vmem:[#allocation8 + $0x20] sm:$0xf] }
  0x26   :  { %v670_v29 = vor.u32 %v734_v26, %v667_v27  ;;  %v717_v32 = vld [vmem:[#allocation8 + $0x24] sm:$0xf0]  ;;  %v657_v33 = vld [vmem:[#allocation8 + $0xa0] sm:$0xf]  ;;  %v716_v36 = vld [vmem:[#allocation8 + $0x24] sm:$0xf] }
  0x27   :  { %149 = vmatpush.bf16.msra.mxu0 %v544_v57  ;;  %162 = vmatpush.bf16.msra.mxu1 %v548_v58  ;;  %v594_v34 = vor.u32 %v717_v32, %v593_v31  ;;  %v733_v35 = vld [vmem:[#allocation8 + $0xa4] sm:$0xf0]  ;;  %v595_v37 = vld [vmem:[#allocation8 + $0x28] sm:$0xf0]  ;;  %v732_v40 = vld [vmem:[#allocation8 + $0xa4] sm:$0xf] }
  0x28   :  { %389 = vmatpush.bf16.msra.mxu2 %v602_v8  ;;  %402 = vmatpush.bf16.msra.mxu3 %v666_v15  ;;  %v658_v38 = vor.u32 %v733_v35, %v657_v33  ;;  %v598_v39 = vor.u32 %v716_v36, %v595_v37  ;;  %v659_v41 = vld [vmem:[#allocation8 + $0xa8] sm:$0xf0]  ;;  %v585_v43 = vld [vmem:[#allocation8 + $0x10] sm:$0xf]  ;;  %v715_v44 = vld [vmem:[#allocation8 + $0x14] sm:$0xf0] }
  0x29   :  { %v662_v42 = vor.u32 %v732_v40, %v659_v41  ;;  %v649_v45 = vld [vmem:[#allocation8 + $0x90] sm:$0xf]  ;;  %v586_v46 = vor.u32 %v715_v44, %v585_v43  ;;  %v731_v47 = vld [vmem:[#allocation8 + $0x94] sm:$0xf0]  ;;  %v714_v48 = vld [vmem:[#allocation8 + $0x14] sm:$0xf] }
  0x2a   :  { %573 = vmatmul.msk.bf16.vlgmr.msra.gmra.mxu0 %vm131_vm1, %v76_v5  ;;  %574 = vmatmul.msk.bf16.vlgmr.msra.gmra.mxu1 %vm131_vm1, %v76_v5  ;;  %v587_v49 = vld [vmem:[#allocation8 + $0x18] sm:$0xf0]  ;;  %v650_v50 = vor.u32 %v731_v47, %v649_v45  ;;  %v730_v52 = vld [vmem:[#allocation8 + $0x94] sm:$0xf]  ;;  %v577_v55 = vld [vmem:[#allocation8] sm:$0xf] }
  0x2b   :  { %411 = vmatpush.bf16.msrb.mxu0 %v638_v60  ;;  %424 = vmatpush.bf16.msrb.mxu1 %v702_v61  ;;  %v590_v51 = vor.u32 %v714_v48, %v587_v49  ;;  %v651_v53 = vld [vmem:[#allocation8 + $0x98] sm:$0xf0]  ;;  %v713_v56 = vld [vmem:[#allocation8 + $0x4] sm:$0xf0]  ;;  %v641_v57 = vld [vmem:[#allocation8 + $0x80] sm:$0xf] }
  0x2c   :  { %390 = vmatpush.bf16.msra.mxu2 %v594_v34  ;;  %403 = vmatpush.bf16.msra.mxu3 %v658_v38  ;;  %v654_v54 = vor.u32 %v730_v52, %v651_v53  ;;  %v578_v58 = vor.u32 %v713_v56, %v577_v55  ;;  %v729_v59 = vld [vmem:[#allocation8 + $0x84] sm:$0xf0]  ;;  %v712_v60 = vld [vmem:[#allocation8 + $0x4] sm:$0xf]  ;;  %v579_v61 = vld [vmem:[#allocation8 + $0x8] sm:$0xf0] }
  0x2d   :  { %v642_v62 = vor.u32 %v729_v59, %v641_v57  ;;  %v582_v63 = vor.u32 %v712_v60, %v579_v61  ;;  %v728_v0 = vld [vmem:[#allocation8 + $0x84] sm:$0xf]  ;;  %v643_v1 = vld [vmem:[#allocation8 + $0x88] sm:$0xf0]  ;;  %v173_v4 = vld [vmem:[#allocation1 + $0x9] sm:$0xff]  ;;  %s530_s23 = sshll.u32 %s936_s7, 4  ;;  %s531_s23 = int_to_ptr.hbm [resolvable:$true] %s530_s23 }
  0x2e   :  { %v646_v2 = vor.u32 %v728_v0, %v643_v1  ;;  %v172_v3 = vld [vmem:[#allocation1] sm:$0xff]  ;;  %v177_v7 = vpack.i.b16 %v173_v4, %v173_v4  ;;  %vm521_vm5 = vcmask 57344  }
  0x2f   :  { %412 = vmatpush.bf16.msrb.mxu0 %v630_v9  ;;  %425 = vmatpush.bf16.msrb.mxu1 %v694_v10  ;;  %v438_v5 = vld [vmem:[%s933_s4] sm:$0x3]  ;;  %v174_v6 = vpack.i.b16 %v172_v3, %v172_v3 }
  0x30   :  { %391 = vmatpush.bf16.msra.mxu2 %v586_v46  ;;  %404 = vmatpush.bf16.msra.mxu3 %v650_v50  ;;  %440 = vst [vmem:[#allocation1] ss:$9 sm:$0xff] %v438_v5  ;;  %v179_v9 = vperm.slane %v177_v7, 0  ;;  %v462_v27 = vld [vmem:[%s934_s5] sm:$0x3]  ;;  %s864_s5 = smov [#allocation9]  }
  0x31   :  { %v176_v8 = vperm.slane %v174_v6, 0  ;;  %s528_s20 = sshll.u32 %s864_s5, 4  ;;  %s529_s20 = int_to_ptr.vmem [resolvable:$true] %s528_s20 }
  0x32   :  { %v183_v14 = vunpack.c.l.bf16 %v179_v9 }
  0x33   :  { %413 = vmatpush.bf16.msrb.mxu0 %v622_v16  ;;  %426 = vmatpush.bf16.msrb.mxu1 %v686_v17  ;;  %v182_v13 = vunpack.c.l.bf16 %v176_v8 }
  0x34   :  { %392 = vmatpush.bf16.msra.mxu2 %v578_v58  ;;  %405 = vmatpush.bf16.msra.mxu3 %v642_v62 }
  0x37   :  { %414 = vmatpush.bf16.msrb.mxu0 %v614_v22  ;;  %427 = vmatpush.bf16.msrb.mxu1 %v678_v23  ;;  %v441_v25 = vld [vmem:[#allocation1] sm:$0xff]  ;;  %v442_v26 = vld [vmem:[#allocation1 + $0x9] sm:$0xff] }
  0x38   :  { %471 = vst [vmem:[#allocation1] ss:$9 sm:$0xff] %v462_v27  ;;  %v443_v32 = vpack.i.b16 %v441_v25, %v441_v25  ;;  %v446_v33 = vpack.i.b16 %v442_v26, %v442_v26 }
  0x3a   :  { %v445_v34 = vperm.slane %v443_v32, 0  ;;  %v448_v35 = vperm.slane %v446_v33, 0 }
  0x3b   :  { %415 = vmatpush.bf16.msrb.mxu0 %v606_v28  ;;  %428 = vmatpush.bf16.msrb.mxu1 %v670_v29  ;;  %v463_v28 = vld [vmem:[#allocation2] sm:$0x1]  ;;  %v863_v29 = vmov 0  }
  0x3c   :  { %751 = vset.pattern.permute.xlu0 %v863_v29  ;;  %v451_v43 = vunpack.c.l.bf16 %v445_v34  ;;  %v452_v44 = vunpack.c.l.bf16 %v448_v35 }
  0x3d   :  { %466 = vperm.xlu0 %751, %v463_v28  }
  0x3f   :  { %416 = vmatpush.bf16.msrb.mxu0 %v598_v39  ;;  %429 = vmatpush.bf16.msrb.mxu1 %v662_v42  ;;  %v472_v55 = vld [vmem:[#allocation1] sm:$0xff]  ;;  %v473_v56 = vld [vmem:[#allocation1 + $0x9] sm:$0xff] }
  0x43   :  { %417 = vmatpush.bf16.msrb.mxu0 %v590_v51  ;;  %430 = vmatpush.bf16.msrb.mxu1 %v654_v54 }
  0x47   :  { %418 = vmatpush.bf16.msrb.mxu0 %v582_v63  ;;  %431 = vmatpush.bf16.msrb.mxu1 %v646_v2 }
  0xa7   :  { %v151_v10 = vpop.f32.mrf.mxu0  ;;  %v164_v11 = vpop.f32.mrf.mxu1 }
  0xa8   :  { %v168_v12 = vpack.c.bf16 %v164_v11, %v151_v10 }
  0xaa   :  { %v180_v15 = vunpack.c.l.bf16 %v168_v12  ;;  %v181_v16 = vunpack.c.h.bf16 %v168_v12 }
  0xac   :  { %v184_v17 = vadd.f32 %v182_v13, %v180_v15  ;;  %v185_v18 = vadd.f32 %v183_v14, %v181_v16 }
  0xae   :  { %v189_v19 = vmax.f32 %v184_v17, 0.0  ;;  %v190_v20 = vmax.f32 %v185_v18, 0.0 }
  0xaf   :  { %v153_v21 = vpop.f32.mrf.mxu0  ;;  %v166_v22 = vpop.f32.mrf.mxu1 }
  0xb0   :  { %v191_v23 = vpack.c.bf16 %v189_v19, %v189_v19  ;;  %v192_v24 = vpack.c.bf16 %v190_v20, %v190_v20  ;;  %v467_v57 = vpop.permute.xlu0 %466 }
  0xb1   :  { %v469_v58 = vperm.slane %v467_v57, 0 }
  0xb2   :  { %393 = vmatmul.bf16.vlgmr.msra.gmra.mxu2 %v191_v23  ;;  %406 = vmatmul.bf16.vlgmr.msra.gmra.mxu3 %v192_v24 }
  0xb3   :  { %419 = vmatmul.bf16.vlgmr.msrb.gmra.mxu0 %v191_v23  ;;  %432 = vmatmul.bf16.vlgmr.msrb.gmra.mxu1 %v192_v24 }
 0x130   :  { %v420_v30 = vpop.f32.mrf.mxu0  ;;  %v433_v31 = vpop.f32.mrf.mxu1 }
 0x131   :  { %v434_v38 = vadd.f32 %v433_v31, %v420_v30 }
 0x135   :  { %v394_v36 = vpop.f32.mrf.mxu2  ;;  %v407_v37 = vpop.f32.mrf.mxu3 }
 0x136   :  { %v408_v39 = vadd.f32 %v407_v37, %v394_v36 }
 0x138   :  { %v437_v40 = vpack.c.bf16 %v434_v38, %v408_v39  ;;  %v422_v41 = vpop.f32.mrf.mxu0  ;;  %v435_v42 = vpop.f32.mrf.mxu1 }
 0x13a   :  { %v449_v45 = vunpack.c.l.bf16 %v437_v40  ;;  %v450_v46 = vunpack.c.h.bf16 %v437_v40 }
 0x13c   :  { %v453_v47 = vadd.f32 %v451_v43, %v449_v45  ;;  %v454_v48 = vadd.f32 %v452_v44, %v450_v46 }
 0x13d   :  { %v396_v49 = vpop.f32.mrf.mxu2  ;;  %v409_v50 = vpop.f32.mrf.mxu3 }
 0x13e   :  { %v458_v51 = vmax.f32 %v453_v47, 0.0  ;;  %v459_v52 = vmax.f32 %v454_v48, 0.0 }
 0x140   :  { %v460_v53 = vpack.c.bf16 %v458_v51, %v458_v51  ;;  %v461_v54 = vpack.c.bf16 %v459_v52, %v459_v52 }
 0x142   :  { %483 = vmatpush.bf16.xpose.msrb.mxu2 %v460_v53  ;;  %496 = vmatpush.bf16.xpose.msrb.mxu3 %v461_v54 }
 0x149   :  { %484 = vmatmul.bf16.vlgmr.msrb.gmra.mxu2 %v472_v55  ;;  %497 = vmatmul.bf16.vlgmr.msrb.gmra.mxu3 %v473_v56 }
 0x1cc   :  { %v485_v59 = vpop.f32.mrf.mxu2  ;;  %v498_v60 = vpop.f32.mrf.mxu3 }
 0x1cd   :  { %v486_v61 = vadd.f32 %v485_v59, %v469_v58 }
 0x1cf   :  { %v499_v62 = vadd.f32 %v498_v60, %v486_v61 }
 0x1d1   :  { %v703_v63 = vmul.f32 -1.442695, %v499_v62 }
 0x1d3   :  { %752 = vpow2.f32 %v703_v63 }
 0x1d4   :  { %v487_v0 = vpop.f32.mrf.mxu2  ;;  %v500_v1 = vpop.f32.mrf.mxu3 }
 0x1d9   :  { %v753_v2 = vpop.eup %752 }
 0x1da   :  { %v505_v3 = vadd.f32 1.0, %v753_v2 }
 0x1dc   :  { %754 = vrcp.f32 %v505_v3  ;;  %v517_v7 = vand.u32 2147483648, %v505_v3  ;;  %v515_v9 = vand.u32 2147483647, %v505_v3  ;;  %vm511_vm3 = vweird.f32 %v505_v3 }
 0x1de   :  { %v518_v11 = vor.u32 1.1754944e-38, %v517_v7  ;;  %vm516_vm6 = vcmp.eq.f32.partialorder %v515_v9, 8.507059e+37 }
 0x1e2   :  { %v755_v4 = vpop.eup %754 }
 0x1e3   :  { %v507_v5 = vmul.f32 %v755_v4, %v505_v3  ;;  %vm512_vm2 = vweird.f32 %v755_v4 }
 0x1e4   :  { %vm513_vm4 = vmor %vm511_vm3, %vm512_vm2 }
 0x1e5   :  { %v508_v6 = vsub.f32 1.0, %v507_v5 }
 0x1e7   :  { %v509_v8 = vmul.f32 %v755_v4, %v508_v6 }
 0x1e9   :  { %v510_v10 = vadd.f32 %v755_v4, %v509_v8 }
 0x1eb   :  { %v514_v12 = vsel %vm513_vm4, %v755_v4, %v510_v10 }
 0x1ec   :  { %v519_v13 = vsel %vm516_vm6, %v518_v11, %v514_v12 }
 0x1ed   :  { %522 = vst.msk [vmem:[#allocation9] sm:$0x1] %vm521_vm5, %v519_v13 }
 0x1ee   :  { %533 = dma.vmem_to_hbm [thread:$0]  %s529_s20, 16, %s531_s23, [#allocation5]  }
 0x1ef   :  { %856 = dma.done.wait [#allocation5], 16  }
 0x1f0   :  { %857 = vsyncadd [#allocation5], 4294967280 }
 0x1f1   :  { %538 = vsyncpa [#allocation4], 1 }
 0x1f2   :  { %539 = vsyncpa [#allocation7], 1 }
 0x1f3   :  { %540 = vsyncpa [#allocation5], 1 }

</bundles_post_ra>
